<compile_context>
chip_gen: v6e
topology: v6e:2x2x1
jax: 0.10.0
libtpu: 0.0.40
codegen_flags: <defaults>
</compile_context>

<pallas_src>
import functools

import jax
import jax.numpy as jnp
from jax import lax
from jax.experimental import pallas as pl
from jax.experimental.pallas import tpu as pltpu


def _contrastive_kernel(x_ref, dem_ref, wt_ref, bt_ref, wx_ref, wh_ref, wd_ref,
                        bh_ref, bd_ref, wp_ref, bp_ref,
                        ts_ref, h_ref, score_ref, xw_ref, *, N, L, inv_temp):
    """Single invocation; time-major flat row layout (row = l * N + n).

    x_ref     : (L*N, C)  bf16   concatenated table features
    dem_ref   : (N, Dd)   f32    demographics
    wt/bt     : (C, E)/(1, E)    timestep encoder (synthetic stand-in)
    wx/wh/bh  : (E, H)/(H, H)/(1, H)  tanh-RNN patient encoder
    wd/bd     : (Dd, H)/(1, H)        demographics -> initial hidden state
    wp/bp     : (H, E)/(1, E)         step predictor (prediction_step = 1)
    ts_ref    : (L*N, E)  f32 out     timestep embeddings
    h_ref     : (L*N, H)  f32 out     patient embeddings
    score_ref : (L-1, N, N) f32 out   contrastive logits (already / temperature)
    xw_ref    : (L*N, H)  f32 scratch hoisted RNN input projection
    """
    f32 = jnp.float32

    # ---- timestep encoder: one lane-dense MXU matmul over M = L*N rows ------
    ts = jnp.tanh(
        jnp.dot(x_ref[...], wt_ref[...], preferred_element_type=f32) + bt_ref[...])
    ts_ref[...] = ts

    # ---- hoisted RNN input projection (recurrence bias folded in) -----------
    xw_ref[...] = jnp.dot(ts, wx_ref[...], preferred_element_type=f32) + bh_ref[...]

    # ---- initial hidden state from demographics (once, before the loop) -----
    h0 = jnp.tanh(
        jnp.dot(dem_ref[...], wd_ref[...], preferred_element_type=f32) + bd_ref[...])

    wh = wh_ref[...]  # hoist recurrent weight load out of the serial loop

    # ---- serial recurrence: only h @ Wh + tanh on the critical path ---------
    def step(l, h):
        row = pl.multiple_of(l * N, N)
        h_new = jnp.tanh(xw_ref[pl.ds(row, N), :]
                         + jnp.dot(h, wh, preferred_element_type=f32))
        h_ref[pl.ds(row, N), :] = h_new
        return h_new

    lax.fori_loop(0, L, step, h0, unroll=True)

    # ---- step-predictor head, hoisted: one matmul over M = (L-1)*N rows -----
    pred = (jnp.dot(h_ref[:(L - 1) * N, :], wp_ref[...], preferred_element_type=f32)
            + bp_ref[...])                                        # ((L-1)*N, E)

    # ---- contrastive scores: one batched matmul over the L-1 timesteps ------
    E = ts.shape[-1]
    ts_next = ts[N:, :].reshape(L - 1, N, E)                      # timesteps 1..L-1
    pred_b = pred.reshape(L - 1, N, E)
    scores = jnp.einsum('lne,lme->lnm', ts_next, pred_b,
                        preferred_element_type=f32)               # (L-1, N, N)
    score_ref[...] = scores * inv_temp


def _encode_and_score(x_flat, dem, params, *, N, L, inv_temp):
    """x_flat: (L*N, C) bf16 time-major flat features; dem: (N, Dd) f32."""
    E = params["wt"].shape[1]
    H = params["wh"].shape[0]
    vspec = pl.BlockSpec(memory_space=pltpu.MemorySpace.VMEM)

    kernel = functools.partial(_contrastive_kernel, N=N, L=L, inv_temp=inv_temp)
    return pl.pallas_call(
        kernel,
        out_shape=(jax.ShapeDtypeStruct((L * N, E), jnp.float32),   # timesteps
                   jax.ShapeDtypeStruct((L * N, H), jnp.float32),   # patient
                   jax.ShapeDtypeStruct((L - 1, N, N), jnp.float32)),  # scores
        in_specs=[vspec] * 11,
        out_specs=(vspec, vspec, vspec),
        scratch_shapes=[pltpu.VMEM((L * N, H), jnp.float32)],
    )(x_flat, dem,
      params["wt"].astype(jnp.bfloat16), params["bt"],
      params["wx"], params["wh"], params["wd"],
      params["bh"], params["bd"], params["wp"], params["bp"])


def contrastive_forward(params, dem, *tables, temperature=0.07):
    """Mirrors ContrastiveModel.forward (prediction_steps = 1).

    dem:     (N, Dd)
    tables:  each (N, L, Ci), concatenated on the channel axis.
    Returns (preds_dict, outputs_dict) matching the PyTorch module.
    """
    N, L, _ = tables[0].shape
    # Single fused relayout: concat tables, go time-major flat (row = l*N + n)
    # and narrow the MXU input stream to bf16 (accumulation stays f32 in-kernel).
    x = jnp.concatenate(tables, axis=-1)                           # (N, L, C)
    x_flat = (jnp.transpose(x, (1, 0, 2))
              .reshape(L * N, x.shape[-1])
              .astype(jnp.bfloat16))                               # (L*N, C)

    ts_flat, h_flat, scores = _encode_and_score(
        x_flat, dem, params, N=N, L=L, inv_temp=1.0 / temperature)

    E = ts_flat.shape[-1]
    H = h_flat.shape[-1]
    # Module API is batch-major; relayout the returned tensors here (tiny at
    # these shapes; at scale the consumer could keep the time-major slabs).
    timesteps = jnp.transpose(ts_flat.reshape(L, N, E), (1, 0, 2))   # (N, L, E)
    patient = jnp.transpose(h_flat.reshape(L, N, H), (1, 0, 2))      # (N, L, H)
    logits = jnp.transpose(scores, (1, 2, 0))                        # (N, N, L-1)

    # nce accuracy metric (detached in torch; strict > is scale-invariant, so
    # using the temperature-scaled scores gives identical results).
    s = lax.stop_gradient(scores)                                    # (L-1, N, N)
    diag = jnp.diagonal(s, axis1=1, axis2=2)                         # (L-1, N)
    beats = diag[:, :, None] > s
    beats = beats | jnp.eye(N, dtype=bool)[None]                     # ignore self
    acc = jnp.mean(jnp.all(beats, axis=-1).astype(jnp.float32))
    accs = acc[None]                                                 # (n_pred_steps,)

    y_trues = jnp.broadcast_to(jnp.arange(N, dtype=jnp.int32)[:, None],
                               (N, logits.shape[-1]))                # (N, L-1)

    preds = {"contrastive": logits, "contrastive_y": y_trues}
    outputs = {"nce_accs": accs, "patient": patient, "timesteps": timesteps}
    return preds, outputs


def init_params(key, *, C, Dd, E, H):
    ks = jax.random.split(key, 5)
    s = 0.1
    return {
        "wt": s * jax.random.normal(ks[0], (C, E), jnp.float32),
        "bt": jnp.zeros((1, E), jnp.float32),
        "wx": s * jax.random.normal(ks[1], (E, H), jnp.float32),
        "wh": s * jax.random.normal(ks[2], (H, H), jnp.float32),
        "wd": s * jax.random.normal(ks[3], (Dd, H), jnp.float32),
        "bh": jnp.zeros((1, H), jnp.float32),
        "bd": jnp.zeros((1, H), jnp.float32),
        "wp": s * jax.random.normal(ks[4], (H, E), jnp.float32),
        "bp": jnp.zeros((1, E), jnp.float32),
    }


if __name__ == "__main__":
    key = jax.random.PRNGKey(0)
    N, L = 8, 8                       # batch (multiple of 8 sublanes), seq length
    C_chart, C_lab, C_out = 16, 8, 8  # per-table channels
    Dd = 8                            # demographics features
    E = 64                            # timestep_encoder.out_size
    H = 64                            # patient_encoder.out_size
    C = C_chart + C_lab + C_out

    k1, k2, k3, k4, k5 = jax.random.split(key, 5)
    chartevents = jax.random.normal(k1, (N, L, C_chart), jnp.float32)
    labevents = jax.random.normal(k2, (N, L, C_lab), jnp.float32)
    outputevents = jax.random.normal(k3, (N, L, C_out), jnp.float32)
    dem = jax.random.normal(k4, (N, Dd), jnp.float32)
    params = init_params(k5, C=C, Dd=Dd, E=E, H=H)

    fwd = jax.jit(functools.partial(contrastive_forward, params))
    preds, outputs = fwd(dem, chartevents, labevents, outputevents)
    jax.block_until_ready((preds, outputs))

    assert preds["contrastive"].shape == (N, N, L - 1)
    assert preds["contrastive_y"].shape == (N, L - 1)
    assert outputs["nce_accs"].shape == (1,)
    assert outputs["patient"].shape == (N, L, H)
    assert outputs["timesteps"].shape == (N, L, E)
    print("KERNEL_OK")
</pallas_src>

<mosaic_0001>
module attributes {stable_mosaic.version = 11 : i64} {
  func.func @_contrastive_kernel(%arg0: memref<64x32xbf16, #tpu.memory_space<vmem>>, %arg1: memref<8x8xf32, #tpu.memory_space<vmem>>, %arg2: memref<32x64xbf16, #tpu.memory_space<vmem>>, %arg3: memref<1x64xf32, #tpu.memory_space<vmem>>, %arg4: memref<64x64xf32, #tpu.memory_space<vmem>>, %arg5: memref<64x64xf32, #tpu.memory_space<vmem>>, %arg6: memref<8x64xf32, #tpu.memory_space<vmem>>, %arg7: memref<1x64xf32, #tpu.memory_space<vmem>>, %arg8: memref<1x64xf32, #tpu.memory_space<vmem>>, %arg9: memref<64x64xf32, #tpu.memory_space<vmem>>, %arg10: memref<1x64xf32, #tpu.memory_space<vmem>>, %arg11: memref<64x64xf32, #tpu.memory_space<vmem>>, %arg12: memref<64x64xf32, #tpu.memory_space<vmem>>, %arg13: memref<7x8x8xf32, #tpu.memory_space<vmem>>, %arg14: memref<64x64xf32, #tpu.memory_space<vmem>>) attributes {dimension_semantics = [], scalar_prefetch = 0 : i64, scratch_operands = 1 : i64, tpu.core_type = #tpu.core_type<tc>} {
    %c0 = arith.constant 0 : index
    %c0_0 = arith.constant 0 : index
    %0 = vector.load %arg0[%c0, %c0_0] : memref<64x32xbf16, #tpu.memory_space<vmem>>, vector<64x32xbf16>
    %c0_1 = arith.constant 0 : index
    %c0_2 = arith.constant 0 : index
    %1 = vector.load %arg2[%c0_1, %c0_2] : memref<32x64xbf16, #tpu.memory_space<vmem>>, vector<32x64xbf16>
    %cst = arith.constant dense<0.000000e+00> : vector<64x64xf32>
    %2 = tpu.matmul %0, %1, %cst {dimension_numbers = #tpu.dot_dimension_numbers<[1], [0], [0], [1], [0, 0, 1, 1], [], []>} : vector<64x32xbf16>, vector<32x64xbf16>, vector<64x64xf32> -> vector<64x64xf32>
    %c0_3 = arith.constant 0 : index
    %c0_4 = arith.constant 0 : index
    %3 = vector.load %arg3[%c0_3, %c0_4] : memref<1x64xf32, #tpu.memory_space<vmem>>, vector<1x64xf32>
    %4 = vector.broadcast %3 : vector<1x64xf32> to vector<64x64xf32>
    %5 = arith.addf %2, %4 : vector<64x64xf32>
    %6 = math.tanh %5 : vector<64x64xf32>
    %c0_5 = arith.constant 0 : index
    %c0_6 = arith.constant 0 : index
    %7 = vector.load %arg11[%c0_5, %c0_6] : memref<64x64xf32, #tpu.memory_space<vmem>>, vector<64x64xf32>
    tpu.vector_store %arg11[%c0_5, %c0_6], %6 {strides = array<i32>} : memref<64x64xf32, #tpu.memory_space<vmem>>, vector<64x64xf32>,
    %c0_7 = arith.constant 0 : index
    %c0_8 = arith.constant 0 : index
    %8 = vector.load %arg4[%c0_7, %c0_8] : memref<64x64xf32, #tpu.memory_space<vmem>>, vector<64x64xf32>
    %cst_9 = arith.constant dense<0.000000e+00> : vector<64x64xf32>
    %9 = tpu.matmul %6, %8, %cst_9 {dimension_numbers = #tpu.dot_dimension_numbers<[1], [0], [0], [1], [0, 0, 1, 1], [], []>} : vector<64x64xf32>, vector<64x64xf32>, vector<64x64xf32> -> vector<64x64xf32>
    %c0_10 = arith.constant 0 : index
    %c0_11 = arith.constant 0 : index
    %10 = vector.load %arg7[%c0_10, %c0_11] : memref<1x64xf32, #tpu.memory_space<vmem>>, vector<1x64xf32>
    %11 = vector.broadcast %10 : vector<1x64xf32> to vector<64x64xf32>
    %12 = arith.addf %9, %11 : vector<64x64xf32>
    %c0_12 = arith.constant 0 : index
    %c0_13 = arith.constant 0 : index
    %13 = vector.load %arg14[%c0_12, %c0_13] : memref<64x64xf32, #tpu.memory_space<vmem>>, vector<64x64xf32>
    tpu.vector_store %arg14[%c0_12, %c0_13], %12 {strides = array<i32>} : memref<64x64xf32, #tpu.memory_space<vmem>>, vector<64x64xf32>,
    %c0_14 = arith.constant 0 : index
    %c0_15 = arith.constant 0 : index
    %14 = vector.load %arg1[%c0_14, %c0_15] : memref<8x8xf32, #tpu.memory_space<vmem>>, vector<8x8xf32>
    %c0_16 = arith.constant 0 : index
    %c0_17 = arith.constant 0 : index
    %15 = vector.load %arg6[%c0_16, %c0_17] : memref<8x64xf32, #tpu.memory_space<vmem>>, vector<8x64xf32>
    %cst_18 = arith.constant dense<0.000000e+00> : vector<8x64xf32>
    %16 = tpu.matmul %14, %15, %cst_18 {dimension_numbers = #tpu.dot_dimension_numbers<[1], [0], [0], [1], [0, 0, 1, 1], [], []>} : vector<8x8xf32>, vector<8x64xf32>, vector<8x64xf32> -> vector<8x64xf32>
    %c0_19 = arith.constant 0 : index
    %c0_20 = arith.constant 0 : index
    %17 = vector.load %arg8[%c0_19, %c0_20] : memref<1x64xf32, #tpu.memory_space<vmem>>, vector<1x64xf32>
    %18 = vector.broadcast %17 : vector<1x64xf32> to vector<8x64xf32>
    %19 = arith.addf %16, %18 : vector<8x64xf32>
    %20 = math.tanh %19 : vector<8x64xf32>
    %c0_21 = arith.constant 0 : index
    %c0_22 = arith.constant 0 : index
    %21 = vector.load %arg5[%c0_21, %c0_22] : memref<64x64xf32, #tpu.memory_space<vmem>>, vector<64x64xf32>
    %c0_i32 = arith.constant 0 : i32
    %c8_i32 = arith.constant 8 : i32
    %22 = arith.muli %c0_i32, %c8_i32 : i32
    %23 = tpu.assume_multiple %22, 8 : i32
    %24 = arith.index_cast %23 : i32 to index
    %c0_23 = arith.constant 0 : index
    %25 = vector.load %arg14[%24, %c0_23] : memref<64x64xf32, #tpu.memory_space<vmem>>, vector<8x64xf32>
    %cst_24 = arith.constant dense<0.000000e+00> : vector<8x64xf32>
    %26 = tpu.matmul %20, %21, %cst_24 {dimension_numbers = #tpu.dot_dimension_numbers<[1], [0], [0], [1], [0, 0, 1, 1], [], []>} : vector<8x64xf32>, vector<64x64xf32>, vector<8x64xf32> -> vector<8x64xf32>
    %27 = arith.addf %25, %26 : vector<8x64xf32>
    %28 = math.tanh %27 : vector<8x64xf32>
    %29 = arith.index_cast %23 : i32 to index
    %c0_25 = arith.constant 0 : index
    %30 = vector.load %arg12[%29, %c0_25] : memref<64x64xf32, #tpu.memory_space<vmem>>, vector<8x64xf32>
    tpu.vector_store %arg12[%29, %c0_25], %28 {strides = array<i32>} : memref<64x64xf32, #tpu.memory_space<vmem>>, vector<8x64xf32>,
    %c1_i32 = arith.constant 1 : i32
    %c8_i32_26 = arith.constant 8 : i32
    %31 = arith.muli %c1_i32, %c8_i32_26 : i32
    %32 = tpu.assume_multiple %31, 8 : i32
    %33 = arith.index_cast %32 : i32 to index
    %c0_27 = arith.constant 0 : index
    %34 = vector.load %arg14[%33, %c0_27] : memref<64x64xf32, #tpu.memory_space<vmem>>, vector<8x64xf32>
    %cst_28 = arith.constant dense<0.000000e+00> : vector<8x64xf32>
    %35 = tpu.matmul %28, %21, %cst_28 {dimension_numbers = #tpu.dot_dimension_numbers<[1], [0], [0], [1], [0, 0, 1, 1], [], []>} : vector<8x64xf32>, vector<64x64xf32>, vector<8x64xf32> -> vector<8x64xf32>
    %36 = arith.addf %34, %35 : vector<8x64xf32>
    %37 = math.tanh %36 : vector<8x64xf32>
    %38 = arith.index_cast %32 : i32 to index
    %c0_29 = arith.constant 0 : index
    %39 = vector.load %arg12[%38, %c0_29] : memref<64x64xf32, #tpu.memory_space<vmem>>, vector<8x64xf32>
    tpu.vector_store %arg12[%38, %c0_29], %37 {strides = array<i32>} : memref<64x64xf32, #tpu.memory_space<vmem>>, vector<8x64xf32>,
    %c2_i32 = arith.constant 2 : i32
    %c8_i32_30 = arith.constant 8 : i32
    %40 = arith.muli %c2_i32, %c8_i32_30 : i32
    %41 = tpu.assume_multiple %40, 8 : i32
    %42 = arith.index_cast %41 : i32 to index
    %c0_31 = arith.constant 0 : index
    %43 = vector.load %arg14[%42, %c0_31] : memref<64x64xf32, #tpu.memory_space<vmem>>, vector<8x64xf32>
    %cst_32 = arith.constant dense<0.000000e+00> : vector<8x64xf32>
    %44 = tpu.matmul %37, %21, %cst_32 {dimension_numbers = #tpu.dot_dimension_numbers<[1], [0], [0], [1], [0, 0, 1, 1], [], []>} : vector<8x64xf32>, vector<64x64xf32>, vector<8x64xf32> -> vector<8x64xf32>
    %45 = arith.addf %43, %44 : vector<8x64xf32>
    %46 = math.tanh %45 : vector<8x64xf32>
    %47 = arith.index_cast %41 : i32 to index
    %c0_33 = arith.constant 0 : index
    %48 = vector.load %arg12[%47, %c0_33] : memref<64x64xf32, #tpu.memory_space<vmem>>, vector<8x64xf32>
    tpu.vector_store %arg12[%47, %c0_33], %46 {strides = array<i32>} : memref<64x64xf32, #tpu.memory_space<vmem>>, vector<8x64xf32>,
    %c3_i32 = arith.constant 3 : i32
    %c8_i32_34 = arith.constant 8 : i32
    %49 = arith.muli %c3_i32, %c8_i32_34 : i32
    %50 = tpu.assume_multiple %49, 8 : i32
    %51 = arith.index_cast %50 : i32 to index
    %c0_35 = arith.constant 0 : index
    %52 = vector.load %arg14[%51, %c0_35] : memref<64x64xf32, #tpu.memory_space<vmem>>, vector<8x64xf32>
    %cst_36 = arith.constant dense<0.000000e+00> : vector<8x64xf32>
    %53 = tpu.matmul %46, %21, %cst_36 {dimension_numbers = #tpu.dot_dimension_numbers<[1], [0], [0], [1], [0, 0, 1, 1], [], []>} : vector<8x64xf32>, vector<64x64xf32>, vector<8x64xf32> -> vector<8x64xf32>
    %54 = arith.addf %52, %53 : vector<8x64xf32>
    %55 = math.tanh %54 : vector<8x64xf32>
    %56 = arith.index_cast %50 : i32 to index
    %c0_37 = arith.constant 0 : index
    %57 = vector.load %arg12[%56, %c0_37] : memref<64x64xf32, #tpu.memory_space<vmem>>, vector<8x64xf32>
    tpu.vector_store %arg12[%56, %c0_37], %55 {strides = array<i32>} : memref<64x64xf32, #tpu.memory_space<vmem>>, vector<8x64xf32>,
    %c4_i32 = arith.constant 4 : i32
    %c8_i32_38 = arith.constant 8 : i32
    %58 = arith.muli %c4_i32, %c8_i32_38 : i32
    %59 = tpu.assume_multiple %58, 8 : i32
    %60 = arith.index_cast %59 : i32 to index
    %c0_39 = arith.constant 0 : index
    %61 = vector.load %arg14[%60, %c0_39] : memref<64x64xf32, #tpu.memory_space<vmem>>, vector<8x64xf32>
    %cst_40 = arith.constant dense<0.000000e+00> : vector<8x64xf32>
    %62 = tpu.matmul %55, %21, %cst_40 {dimension_numbers = #tpu.dot_dimension_numbers<[1], [0], [0], [1], [0, 0, 1, 1], [], []>} : vector<8x64xf32>, vector<64x64xf32>, vector<8x64xf32> -> vector<8x64xf32>
    %63 = arith.addf %61, %62 : vector<8x64xf32>
    %64 = math.tanh %63 : vector<8x64xf32>
    %65 = arith.index_cast %59 : i32 to index
    %c0_41 = arith.constant 0 : index
    %66 = vector.load %arg12[%65, %c0_41] : memref<64x64xf32, #tpu.memory_space<vmem>>, vector<8x64xf32>
    tpu.vector_store %arg12[%65, %c0_41], %64 {strides = array<i32>} : memref<64x64xf32, #tpu.memory_space<vmem>>, vector<8x64xf32>,
    %c5_i32 = arith.constant 5 : i32
    %c8_i32_42 = arith.constant 8 : i32
    %67 = arith.muli %c5_i32, %c8_i32_42 : i32
    %68 = tpu.assume_multiple %67, 8 : i32
    %69 = arith.index_cast %68 : i32 to index
    %c0_43 = arith.constant 0 : index
    %70 = vector.load %arg14[%69, %c0_43] : memref<64x64xf32, #tpu.memory_space<vmem>>, vector<8x64xf32>
    %cst_44 = arith.constant dense<0.000000e+00> : vector<8x64xf32>
    %71 = tpu.matmul %64, %21, %cst_44 {dimension_numbers = #tpu.dot_dimension_numbers<[1], [0], [0], [1], [0, 0, 1, 1], [], []>} : vector<8x64xf32>, vector<64x64xf32>, vector<8x64xf32> -> vector<8x64xf32>
    %72 = arith.addf %70, %71 : vector<8x64xf32>
    %73 = math.tanh %72 : vector<8x64xf32>
    %74 = arith.index_cast %68 : i32 to index
    %c0_45 = arith.constant 0 : index
    %75 = vector.load %arg12[%74, %c0_45] : memref<64x64xf32, #tpu.memory_space<vmem>>, vector<8x64xf32>
    tpu.vector_store %arg12[%74, %c0_45], %73 {strides = array<i32>} : memref<64x64xf32, #tpu.memory_space<vmem>>, vector<8x64xf32>,
    %c6_i32 = arith.constant 6 : i32
    %c8_i32_46 = arith.constant 8 : i32
    %76 = arith.muli %c6_i32, %c8_i32_46 : i32
    %77 = tpu.assume_multiple %76, 8 : i32
    %78 = arith.index_cast %77 : i32 to index
    %c0_47 = arith.constant 0 : index
    %79 = vector.load %arg14[%78, %c0_47] : memref<64x64xf32, #tpu.memory_space<vmem>>, vector<8x64xf32>
    %cst_48 = arith.constant dense<0.000000e+00> : vector<8x64xf32>
    %80 = tpu.matmul %73, %21, %cst_48 {dimension_numbers = #tpu.dot_dimension_numbers<[1], [0], [0], [1], [0, 0, 1, 1], [], []>} : vector<8x64xf32>, vector<64x64xf32>, vector<8x64xf32> -> vector<8x64xf32>
    %81 = arith.addf %79, %80 : vector<8x64xf32>
    %82 = math.tanh %81 : vector<8x64xf32>
    %83 = arith.index_cast %77 : i32 to index
    %c0_49 = arith.constant 0 : index
    %84 = vector.load %arg12[%83, %c0_49] : memref<64x64xf32, #tpu.memory_space<vmem>>, vector<8x64xf32>
    tpu.vector_store %arg12[%83, %c0_49], %82 {strides = array<i32>} : memref<64x64xf32, #tpu.memory_space<vmem>>, vector<8x64xf32>,
    %c7_i32 = arith.constant 7 : i32
    %c8_i32_50 = arith.constant 8 : i32
    %85 = arith.muli %c7_i32, %c8_i32_50 : i32
    %86 = tpu.assume_multiple %85, 8 : i32
    %87 = arith.index_cast %86 : i32 to index
    %c0_51 = arith.constant 0 : index
    %88 = vector.load %arg14[%87, %c0_51] : memref<64x64xf32, #tpu.memory_space<vmem>>, vector<8x64xf32>
    %cst_52 = arith.constant dense<0.000000e+00> : vector<8x64xf32>
    %89 = tpu.matmul %82, %21, %cst_52 {dimension_numbers = #tpu.dot_dimension_numbers<[1], [0], [0], [1], [0, 0, 1, 1], [], []>} : vector<8x64xf32>, vector<64x64xf32>, vector<8x64xf32> -> vector<8x64xf32>
    %90 = arith.addf %88, %89 : vector<8x64xf32>
    %91 = math.tanh %90 : vector<8x64xf32>
    %92 = arith.index_cast %86 : i32 to index
    %c0_53 = arith.constant 0 : index
    %93 = vector.load %arg12[%92, %c0_53] : memref<64x64xf32, #tpu.memory_space<vmem>>, vector<8x64xf32>
    tpu.vector_store %arg12[%92, %c0_53], %91 {strides = array<i32>} : memref<64x64xf32, #tpu.memory_space<vmem>>, vector<8x64xf32>,
    %c8_i32_54 = arith.constant 8 : i32
    %c0_55 = arith.constant 0 : index
    %c0_56 = arith.constant 0 : index
    %94 = vector.load %arg12[%c0_55, %c0_56] : memref<64x64xf32, #tpu.memory_space<vmem>>, vector<56x64xf32>
    %c0_57 = arith.constant 0 : index
    %c0_58 = arith.constant 0 : index
    %95 = vector.load %arg9[%c0_57, %c0_58] : memref<64x64xf32, #tpu.memory_space<vmem>>, vector<64x64xf32>
    %cst_59 = arith.constant dense<0.000000e+00> : vector<56x64xf32>
    %96 = tpu.matmul %94, %95, %cst_59 {dimension_numbers = #tpu.dot_dimension_numbers<[1], [0], [0], [1], [0, 0, 1, 1], [], []>} : vector<56x64xf32>, vector<64x64xf32>, vector<56x64xf32> -> vector<56x64xf32>
    %c0_60 = arith.constant 0 : index
    %c0_61 = arith.constant 0 : index
    %97 = vector.load %arg10[%c0_60, %c0_61] : memref<1x64xf32, #tpu.memory_space<vmem>>, vector<1x64xf32>
    %98 = vector.broadcast %97 : vector<1x64xf32> to vector<56x64xf32>
    %99 = arith.addf %96, %98 : vector<56x64xf32>
    %100 = vector.extract_strided_slice %6 {offsets = [8, 0], sizes = [56, 64], strides = [1, 1]} : vector<64x64xf32> to vector<56x64xf32>
    %101 = vector.shape_cast %100 : vector<56x64xf32> to vector<7x8x64xf32>
    %102 = vector.shape_cast %99 : vector<56x64xf32> to vector<7x8x64xf32>
    "tpu.trace_start"() <{level = 10 : i32, message = "lne,lme->lnm"}> : () -> ()
    %cst_62 = arith.constant dense<0.000000e+00> : vector<7x8x8xf32>
    %103 = tpu.matmul %101, %102, %cst_62 {dimension_numbers = #tpu.dot_dimension_numbers<[2], [2], [1], [1], [0, 0, 0, 1, 1, 1], [0], [0]>} : vector<7x8x64xf32>, vector<7x8x64xf32>, vector<7x8x8xf32> -> vector<7x8x8xf32>
    "tpu.trace_stop"() : () -> ()
    %cst_63 = arith.constant 14.2857141 : f32
    %104 = vector.broadcast %cst_63 : f32 to vector<7x8x8xf32>
    %105 = arith.mulf %103, %104 : vector<7x8x8xf32>
    %c0_64 = arith.constant 0 : index
    %c0_65 = arith.constant 0 : index
    %c0_66 = arith.constant 0 : index
    %106 = vector.load %arg13[%c0_64, %c0_65, %c0_66] : memref<7x8x8xf32, #tpu.memory_space<vmem>>, vector<7x8x8xf32>
    tpu.vector_store %arg13[%c0_64, %c0_65, %c0_66], %105 {strides = array<i32>} : memref<7x8x8xf32, #tpu.memory_space<vmem>>, vector<7x8x8xf32>,
    return
  }
}

</mosaic_0001>

<bundles_post_ra>
// kernel: contrastive_forward.1
= control target key start
LH: loop header
LB: loop body
LE: loop exit
PB: predicated region body
PF: predicated region fallthrough
CT: control target
= control target key end

     0   :  { %vm93_vm0 = vcmask 261120   ;;  %v2237_v5 = vmov 0.0   ;;  %vm2238_vm1 = vmmov 0   ;;  %vm349_vm2 = vcmask 64512   ;;  %s2821_s2 = inlined_call_operand.vmem [shape: bf16[32,64], index: 2, kind: input, shape index: {}]   ;;  %s2822_s0 = inlined_call_operand.vmem [shape: bf16[64,32], index: 0, kind: input, shape index: {}]   ;;  %s2823_s6 = inlined_call_operand.vmem [shape: f32[8,64], index: 6, kind: input, shape index: {}]   ;;  %s2824_s1 = inlined_call_operand.vmem [shape: f32[8,8], index: 1, kind: input, shape index: {}]   ;;  %s2825_s4 = inlined_call_operand.vmem [shape: f32[64,64], index: 4, kind: input, shape index: {}]   ;;  %s2826_s5 = inlined_call_operand.vmem [shape: f32[64,64], index: 5, kind: input, shape index: {}]   ;;  %s2827_s3 = inlined_call_operand.vmem [shape: f32[1,64], index: 3, kind: input, shape index: {}, may-alias: {3,7,8,10}]   ;;  %s2828_s8 = inlined_call_operand.vmem [shape: f32[1,64], index: 8, kind: input, shape index: {}, may-alias: {3,7,8,10}]   ;;  %s2829_s11 = inlined_call_operand.vmem [shape: f32[64,64], index: 11, kind: output, shape index: {0}]   ;;  %s2830_s7 = inlined_call_operand.vmem [shape: f32[1,64], index: 7, kind: input, shape index: {}, may-alias: {3,7,8,10}]   ;;  %s2831_s12 = inlined_call_operand.vmem [shape: f32[64,64], index: 12, kind: output, shape index: {1}]   ;;  %s2832_s9 = inlined_call_operand.vmem [shape: f32[64,64], index: 9, kind: input, shape index: {}]   ;;  %s2833_s10 = inlined_call_operand.vmem [shape: f32[1,64], index: 10, kind: input, shape index: {}, may-alias: {3,7,8,10}]   ;;  %s2834_s13 = inlined_call_operand.vmem [shape: f32[7,8,8], index: 13, kind: output, shape index: {2}]  }
   0x1   :  { %v2197_v0 = vld [vmem:[%s2821_s2 + $0x8] sm:$0xff]   ;;  %v2198_v1 = vld [vmem:[%s2821_s2] sm:$0xff]   ;;  %v2201_v4 = vld [vmem:[%s2822_s0 + $0x10] sm:$0xff]   ;;  %vm179_vm3 = vcmask 523264  }
   0x2   :  { %1926 = vmatprep.subr.bf16.mxu0 %v2197_v0  ;;  %v2199_v2 = vld [vmem:[%s2822_s0] sm:$0xff]   ;;  %v2200_v3 = vld [vmem:[%s2822_s0 + $0x8] sm:$0xff]   ;;  %v2202_v7 = vld [vmem:[%s2822_s0 + $0x18] sm:$0xff]  }
   0x3   :  { %1927 = vmatpush3.bf16.msra.mxu0 %v2197_v0  ;;  %1930 = vmatprep.mubr.msk.bf16.mxu0 %vm93_vm0, %v2199_v2  ;;  %v341_v6 = vld [vmem:[%s2823_s6] sm:$0xff]  ;;  %v195_v9 = vld [vmem:[%s2825_s4 + $0x38] sm:$0xff]  ;;  %v194_v10 = vld [vmem:[%s2825_s4 + $0x30] sm:$0xff] }
   0x4   :  { %1928 = vmatprep.subr.bf16.mxu0 %v2198_v1  ;;  %v340_v8 = vld [vmem:[%s2824_s1] sm:$0xff]  ;;  %1938 = vmatprep.subr.mxu1 %v195_v9  ;;  %v193_v11 = vld [vmem:[%s2825_s4 + $0x28] sm:$0xff]  ;;  %v191_v13 = vld [vmem:[%s2825_s4 + $0x18] sm:$0xff] }
   0x5   :  { %1939 = vmatpush3.msra.mxu1 %v195_v9  ;;  %v192_v12 = vld [vmem:[%s2825_s4 + $0x20] sm:$0xff]  ;;  %v190_v14 = vld [vmem:[%s2825_s4 + $0x10] sm:$0xff]  ;;  %v189_v15 = vld [vmem:[%s2825_s4 + $0x8] sm:$0xff] }
   0x6   :  { %1940 = vmatprep.subr.mxu1 %v194_v10  ;;  %v188_v16 = vld [vmem:[%s2825_s4] sm:$0xff]  ;;  %v2372_v17 = vld [vmem:[%s2826_s5 + $0x38] sm:$0xff]  ;;  %v2378_v18 = vld [vmem:[%s2826_s5 + $0x30] sm:$0xff] }
   0x7   :  { %1929 = vmatpush3.bf16.msra.mxu0 %v2198_v1  ;;  %1941 = vmatpush3.msra.mxu1 %v194_v10  ;;  %v2385_v19 = vld [vmem:[%s2826_s5 + $0x28] sm:$0xff]  ;;  %v2392_v20 = vld [vmem:[%s2826_s5 + $0x20] sm:$0xff]  ;;  %v2399_v21 = vld [vmem:[%s2826_s5 + $0x18] sm:$0xff] }
   0x8   :  { %1966 = vmatprep.subr.mxu0 %v2237_v5  ;;  %1942 = vmatprep.subr.mxu1 %v193_v11  ;;  %v2406_v22 = vld [vmem:[%s2826_s5 + $0x10] sm:$0xff]  ;;  %v2413_v23 = vld [vmem:[%s2826_s5 + $0x8] sm:$0xff]  ;;  %v2420_v24 = vld [vmem:[%s2826_s5] sm:$0xff] }
   0x9   :  { %1943 = vmatpush3.msra.mxu1 %v193_v11  ;;  %v1742_v25 = vld [vmem:[%s2827_s3] ss:$0 sm:$0xff] }
   0xa   :  { %1931 = vmatmul.mubr.msk.bf16.vlgmr.msra.gmra.mxu0 %vm93_vm0, %v2200_v3  ;;  %1944 = vmatprep.subr.mxu1 %v192_v12  ;;  %v1762_v43 = vld [vmem:[%s2828_s8] ss:$0 sm:$0xff] }
   0xb   :  { %1934 = vmatprep.mubr.msk.bf16.mxu0 %vm93_vm0, %v2201_v4  ;;  %1967 = vmatpush3.msra.mxu0 %v341_v6  ;;  %v1753_v55 = vld [vmem:[%s2830_s7] ss:$0 sm:$0xff] }
   0xc   :  { %1990 = vmatprep.subr.mxu0 %v2237_v5  ;;  %1945 = vmatpush3.msra.mxu1 %v192_v12 }
   0xd   :  { %1946 = vmatprep.subr.mxu1 %v191_v13 }
   0xe   :  { %1947 = vmatpush3.msra.mxu1 %v191_v13 }
   0xf   :  { %1948 = vmatprep.subr.mxu1 %v190_v14 }
  0x10   :  { %1949 = vmatpush3.msra.mxu1 %v190_v14 }
  0x11   :  { %1950 = vmatprep.subr.mxu1 %v189_v15 }
  0x12   :  { %1935 = vmatmul.mubr.msk.bf16.gmra.mxu0 %vm93_vm0, %v2202_v7  ;;  %1951 = vmatpush3.msra.mxu1 %v189_v15 }
  0x13   :  { %1968 = vmatprep.mubr.msk.f32.mxu0 %vm2238_vm1, %v2237_v5  ;;  %1952 = vmatprep.subr.mxu1 %v188_v16 }
  0x14   :  { %1953 = vmatpush3.msra.mxu1 %v188_v16 }
  0x15   :  { %1971 = vmatprep.subr.mxu1 %v2237_v5 }
  0x1a   :  { %1969 = vmatmul.mubr.msk.f32.vlgmr.msra.gmra.mxu0 %vm349_vm2, %v340_v8 }
  0x1b   :  { %2006 = vmatprep.mubr.msk.f32.mxu0 %vm2238_vm1, %v2237_v5  ;;  %1991 = vmatpush3.msra.mxu0 %v2372_v17 }
  0x1c   :  { %1992 = vmatprep.subr.mxu0 %v2237_v5 }
  0x1d   :  { %1993 = vmatpush3.msra.mxu0 %v2378_v18 }
  0x1e   :  { %1994 = vmatprep.subr.mxu0 %v2237_v5 }
  0x1f   :  { %1995 = vmatpush3.msra.mxu0 %v2385_v19 }
  0x20   :  { %1996 = vmatprep.subr.mxu0 %v2237_v5 }
  0x21   :  { %1997 = vmatpush3.msra.mxu0 %v2392_v20 }
  0x22   :  { %1998 = vmatprep.subr.mxu0 %v2237_v5 }
  0x23   :  { %1999 = vmatpush3.msra.mxu0 %v2399_v21 }
  0x24   :  { %2000 = vmatprep.subr.mxu0 %v2237_v5 }
  0x25   :  { %2001 = vmatpush3.msra.mxu0 %v2406_v22 }
  0x26   :  { %2002 = vmatprep.subr.mxu0 %v2237_v5 }
  0x27   :  { %2003 = vmatpush3.msra.mxu0 %v2413_v23 }
  0x28   :  { %2004 = vmatprep.subr.mxu0 %v2237_v5 }
  0x29   :  { %2005 = vmatpush3.msra.mxu0 %v2420_v24 }
  0x2a   :  { %2028 = vmatprep.subr.mxu0 %v2237_v5 }
  0xca   :  { %v1932_v26 = vpop.f32.mrf.mxu0 }
  0xcb   :  { %v149_v27 = vadd.f32 %v1932_v26, %v1742_v25 }
  0xcc   :  { %v140_v28 = vpop.f32.mrf.mxu0 }
  0xcd   :  { %2203 = vtanh.f32 %v149_v27  ;;  %v141_v29 = vadd.f32 %v1742_v25, %v140_v28 }
  0xce   :  { %v1933_v30 = vpop.f32.mrf.mxu0 }
  0xcf   :  { %2205 = vtanh.f32 %v141_v29  ;;  %v152_v31 = vadd.f32 %v1933_v30, %v1742_v25 }
  0xd0   :  { %v143_v32 = vpop.f32.mrf.mxu0 }
  0xd1   :  { %2207 = vtanh.f32 %v152_v31  ;;  %v144_v33 = vadd.f32 %v1742_v25, %v143_v32 }
  0xd2   :  { %v1936_v34 = vpop.f32.mrf.mxu0 }
  0xd3   :  { %2209 = vtanh.f32 %v144_v33  ;;  %v165_v35 = vadd.f32 %v1936_v34, %v1742_v25 }
  0xd4   :  { %v156_v36 = vpop.f32.mrf.mxu0 }
  0xd5   :  { %2211 = vtanh.f32 %v165_v35  ;;  %v157_v37 = vadd.f32 %v1742_v25, %v156_v36 }
  0xd6   :  { %v1937_v38 = vpop.f32.mrf.mxu0 }
  0xd7   :  { %2213 = vtanh.f32 %v157_v37  ;;  %v168_v39 = vadd.f32 %v1937_v38, %v1742_v25 }
  0xd8   :  { %v159_v40 = vpop.f32.mrf.mxu0 }
  0xd9   :  { %2215 = vtanh.f32 %v168_v39  ;;  %v160_v41 = vadd.f32 %v1742_v25, %v159_v40 }
  0xda   :  { %v2428_v42 = vpop.eup %2203  ;;  %v419_v44 = vpop.f32.mrf.mxu0 }
  0xdb   :  { %182 = vst.msk [vmem:[%s2829_s11 + $0x10] sm:$0xff] %vm179_vm3, %v2428_v42  ;;  %2217 = vtanh.f32 %v160_v41  ;;  %v420_v47 = vadd.f32 %v1762_v43, %v419_v44  ;;  %v1073_v43 = vld [vmem:[%s2832_s9 + $0x20] sm:$0xff]  ;;  %v1072_v44 = vld [vmem:[%s2832_s9 + $0x18] sm:$0xff] }
  0xdc   :  { %v2206_v45 = vpop.eup %2205  ;;  %v1970_v46 = vpop.f32.mrf.mxu0 }
  0xdd   :  { %180 = vst.msk [vmem:[%s2829_s11] sm:$0xff] %vm179_vm3, %v2206_v45  ;;  %1954 = vmatprep.mubr.msk.f32.mxu1 %vm179_vm3, %v2206_v45  ;;  %2219 = vtanh.f32 %v420_v47  ;;  %v1071_v45 = vld [vmem:[%s2832_s9 + $0x10] sm:$0xff]  ;;  %v1070_v46 = vld [vmem:[%s2832_s9 + $0x8] sm:$0xff]  ;;  %v1069_v47 = vld [vmem:[%s2832_s9] sm:$0xff] }
  0xde   :  { %v2443_v48 = vpop.eup %2207 }
  0xdf   :  { %183 = vst.msk [vmem:[%s2829_s11 + $0x18] sm:$0xff] %vm179_vm3, %v2443_v48 }
  0xe0   :  { %v2450_v49 = vpop.eup %2209 }
  0xe1   :  { %181 = vst.msk [vmem:[%s2829_s11 + $0x8] sm:$0xff] %vm179_vm3, %v2450_v49  ;;  %1955 = vmatmul.mubr.msk.f32.vlgmr.msra.gmra.mxu1 %vm179_vm3, %v2450_v49 }
  0xe2   :  { %v2459_v50 = vpop.eup %2211  ;;  %1957 = vmatprep.mubr.msk.f32.mxu1 %vm179_vm3, %v2428_v42  ;;  %1972 = vmatpush3.msra.mxu1 %v2372_v17 }
  0xe3   :  { %186 = vst.msk [vmem:[%s2829_s11 + $0x30] sm:$0xff] %vm179_vm3, %v2459_v50  ;;  %1973 = vmatprep.subr.mxu1 %v2237_v5 }
  0xe4   :  { %v2470_v51 = vpop.eup %2213  ;;  %1974 = vmatpush3.msra.mxu1 %v2378_v18 }
  0xe5   :  { %184 = vst.msk [vmem:[%s2829_s11 + $0x20] sm:$0xff] %vm179_vm3, %v2470_v51  ;;  %1958 = vmatmul.mubr.msk.f32.gmra.mxu1 %vm179_vm3, %v2443_v48  ;;  %1975 = vmatprep.subr.mxu1 %v2237_v5 }
  0xe6   :  { %v2481_v52 = vpop.eup %2215  ;;  %1960 = vmatprep.mubr.msk.f32.mxu1 %vm179_vm3, %v2470_v51  ;;  %1976 = vmatpush3.msra.mxu1 %v2385_v19 }
  0xe7   :  { %187 = vst.msk [vmem:[%s2829_s11 + $0x38] sm:$0xff] %vm179_vm3, %v2481_v52  ;;  %1977 = vmatprep.subr.mxu1 %v2237_v5 }
  0xe8   :  { %v2492_v53 = vpop.eup %2217  ;;  %1978 = vmatpush3.msra.mxu1 %v2392_v20 }
  0xe9   :  { %185 = vst.msk [vmem:[%s2829_s11 + $0x28] sm:$0xff] %vm179_vm3, %v2492_v53  ;;  %1961 = vmatmul.mubr.msk.f32.gmra.mxu1 %vm179_vm3, %v2492_v53  ;;  %1979 = vmatprep.subr.mxu1 %v2237_v5 }
  0xea   :  { %1963 = vmatprep.mubr.msk.f32.mxu1 %vm179_vm3, %v2459_v50  ;;  %1980 = vmatpush3.msra.mxu1 %v2399_v21  ;;  %v2220_v54 = vpop.eup %2219 }
  0xeb   :  { %1981 = vmatprep.subr.mxu1 %v2237_v5 }
  0xec   :  { %1982 = vmatpush3.msra.mxu1 %v2406_v22 }
  0xed   :  { %1964 = vmatmul.mubr.msk.f32.gmra.mxu1 %vm179_vm3, %v2481_v52  ;;  %1983 = vmatprep.subr.mxu1 %v2237_v5 }
  0xee   :  { %1984 = vmatpush3.msra.mxu1 %v2413_v23  ;;  %1987 = vmatprep.mubr.msk.f32.mxu1 %vm2238_vm1, %v2237_v5 }
  0xef   :  { %1985 = vmatprep.subr.mxu1 %v2237_v5 }
  0xf0   :  { %1986 = vmatpush3.msra.mxu1 %v2420_v24 }
  0xf1   :  { %1988 = vmatmul.mubr.msk.f32.vlgmr.msra.gmra.mxu1 %vm179_vm3, %v2220_v54  ;;  %2009 = vmatprep.subr.mxu1 %v2237_v5 }
  0xf2   :  { %2010 = vmatpush3.msra.mxu1 %v2372_v17  ;;  %2025 = vmatprep.mubr.msk.f32.mxu1 %vm2238_vm1, %v2237_v5 }
  0xf3   :  { %2011 = vmatprep.subr.mxu1 %v2237_v5 }
  0xf4   :  { %2012 = vmatpush3.msra.mxu1 %v2378_v18 }
  0xf5   :  { %2013 = vmatprep.subr.mxu1 %v2237_v5 }
  0xf6   :  { %2014 = vmatpush3.msra.mxu1 %v2385_v19 }
  0xf7   :  { %2015 = vmatprep.subr.mxu1 %v2237_v5 }
  0xf8   :  { %2016 = vmatpush3.msra.mxu1 %v2392_v20 }
  0xf9   :  { %2017 = vmatprep.subr.mxu1 %v2237_v5 }
  0xfa   :  { %2018 = vmatpush3.msra.mxu1 %v2399_v21 }
  0xfb   :  { %2019 = vmatprep.subr.mxu1 %v2237_v5 }
  0xfc   :  { %2020 = vmatpush3.msra.mxu1 %v2406_v22 }
  0xfd   :  { %2021 = vmatprep.subr.mxu1 %v2237_v5 }
  0xfe   :  { %2022 = vmatpush3.msra.mxu1 %v2413_v23 }
  0xff   :  { %2023 = vmatprep.subr.mxu1 %v2237_v5 }
 0x100   :  { %2024 = vmatpush3.msra.mxu1 %v2420_v24 }
 0x101   :  { %2047 = vmatprep.subr.mxu1 %v2237_v5 }
 0x1a1   :  { %v1956_v56 = vpop.f32.mrf.mxu1 }
 0x1a2   :  { %v299_v57 = vadd.f32 %v1956_v56, %v1753_v55 }
 0x1a3   :  { %v293_v58 = vpop.f32.mrf.mxu1 }
 0x1a4   :  { %333 = vst.msk [vmem:[#allocation2 + $0x8] sm:$0xff] %vm179_vm3, %v299_v57  ;;  %v294_v59 = vadd.f32 %v1753_v55, %v293_v58 }
 0x1a5   :  { %v1959_v60 = vpop.f32.mrf.mxu1 }
 0x1a6   :  { %332 = vst.msk [vmem:[#allocation2] sm:$0xff] %vm179_vm3, %v294_v59  ;;  %v309_v61 = vadd.f32 %v1959_v60, %v1753_v55 }
 0x1a7   :  { %v303_v62 = vpop.f32.mrf.mxu1 }
 0x1a8   :  { %335 = vst.msk [vmem:[#allocation2 + $0x18] sm:$0xff] %vm179_vm3, %v309_v61  ;;  %v304_v63 = vadd.f32 %v1753_v55, %v303_v62 }
 0x1a9   :  { %v1962_v0 = vpop.f32.mrf.mxu1 }
 0x1aa   :  { %334 = vst.msk [vmem:[#allocation2 + $0x10] sm:$0xff] %vm179_vm3, %v304_v63  ;;  %v319_v1 = vadd.f32 %v1962_v0, %v1753_v55  ;;  %v1779_v0 = vld [vmem:[%s2833_s10] ss:$0 sm:$0xff] }
 0x1ab   :  { %v313_v2 = vpop.f32.mrf.mxu1  ;;  %v510_v14 = vld [vmem:[#allocation2 + $0x8] sm:$0xff] }
 0x1ac   :  { %337 = vst.msk [vmem:[#allocation2 + $0x28] sm:$0xff] %vm179_vm3, %v319_v1  ;;  %v314_v3 = vadd.f32 %v1753_v55, %v313_v2 }
 0x1ad   :  { %v1965_v4 = vpop.f32.mrf.mxu1  ;;  %v432_v9 = vld [vmem:[#allocation2] sm:$0xff] }
 0x1ae   :  { %336 = vst.msk [vmem:[#allocation2 + $0x20] sm:$0xff] %vm179_vm3, %v314_v3  ;;  %v329_v6 = vadd.f32 %v1965_v4, %v1753_v55 }
 0x1af   :  { %v323_v7 = vpop.f32.mrf.mxu1  ;;  %v668_v32 = vld [vmem:[#allocation2 + $0x18] sm:$0xff] }
 0x1b0   :  { %339 = vst.msk [vmem:[#allocation2 + $0x38] sm:$0xff] %vm179_vm3, %v329_v6  ;;  %v324_v8 = vadd.f32 %v1753_v55, %v323_v7 }
 0x1b1   :  { %v502_v10 = vpop.f32.mrf.mxu1  ;;  %v589_v27 = vld [vmem:[#allocation2 + $0x10] sm:$0xff] }
 0x1b2   :  { %338 = vst.msk [vmem:[#allocation2 + $0x30] sm:$0xff] %vm179_vm3, %v324_v8  ;;  %v506_v11 = vadd.f32 %v502_v10, %v432_v9 }
 0x1b3   :  { %v1989_v12 = vpop.f32.mrf.mxu1 }
 0x1b4   :  { %2221 = vtanh.f32 %v506_v11 }
 0x1b5   :  { %v747_v37 = vld [vmem:[#allocation2 + $0x20] sm:$0xff] }
 0x1b9   :  { %v905_v60 = vld [vmem:[#allocation2 + $0x30] sm:$0xff] }
 0x1c1   :  { %v2222_v13 = vpop.eup %2221 }
 0x1c2   :  { %508 = vst.msk [vmem:[%s2831_s12] sm:$0xff] %vm179_vm3, %v2222_v13  ;;  %2007 = vmatmul.mubr.msk.f32.vlgmr.msra.gmra.mxu0 %vm179_vm3, %v2222_v13 }
 0x1c3   :  { %2029 = vmatpush3.msra.mxu0 %v2372_v17  ;;  %2044 = vmatprep.mubr.msk.f32.mxu0 %vm2238_vm1, %v2237_v5 }
 0x1c4   :  { %2030 = vmatprep.subr.mxu0 %v2237_v5 }
 0x1c5   :  { %2031 = vmatpush3.msra.mxu0 %v2378_v18 }
 0x1c6   :  { %2032 = vmatprep.subr.mxu0 %v2237_v5 }
 0x1c7   :  { %2033 = vmatpush3.msra.mxu0 %v2385_v19 }
 0x1c8   :  { %2034 = vmatprep.subr.mxu0 %v2237_v5 }
 0x1c9   :  { %2035 = vmatpush3.msra.mxu0 %v2392_v20  ;;  %v1062_v54 = vld [vmem:[%s2831_s12] sm:$0xff] }
 0x1ca   :  { %2036 = vmatprep.subr.mxu0 %v2237_v5 }
 0x1cb   :  { %2037 = vmatpush3.msra.mxu0 %v2399_v21 }
 0x1cc   :  { %2038 = vmatprep.subr.mxu0 %v2237_v5 }
 0x1cd   :  { %2039 = vmatpush3.msra.mxu0 %v2406_v22 }
 0x1ce   :  { %2040 = vmatprep.subr.mxu0 %v2237_v5 }
 0x1cf   :  { %2041 = vmatpush3.msra.mxu0 %v2413_v23 }
 0x1d0   :  { %2042 = vmatprep.subr.mxu0 %v2237_v5 }
 0x1d1   :  { %2043 = vmatpush3.msra.mxu0 %v2420_v24 }
 0x1d2   :  { %2066 = vmatprep.subr.mxu0 %v2237_v5 }
 0x282   :  { %v580_v15 = vpop.f32.mrf.mxu0 }
 0x283   :  { %v584_v16 = vadd.f32 %v580_v15, %v510_v14 }
 0x284   :  { %v2008_v25 = vpop.f32.mrf.mxu0 }
 0x285   :  { %2223 = vtanh.f32 %v584_v16 }
 0x292   :  { %v2224_v26 = vpop.eup %2223 }
 0x293   :  { %1766 = vst.msk [vmem:[%s2831_s12 + $0x8] sm:$0xff] %vm179_vm3, %v2224_v26  ;;  %2026 = vmatmul.mubr.msk.f32.vlgmr.msra.gmra.mxu1 %vm179_vm3, %v2224_v26 }
 0x294   :  { %2048 = vmatpush3.msra.mxu1 %v2372_v17  ;;  %2063 = vmatprep.mubr.msk.f32.mxu1 %vm2238_vm1, %v2237_v5 }
 0x295   :  { %2049 = vmatprep.subr.mxu1 %v2237_v5 }
 0x296   :  { %2050 = vmatpush3.msra.mxu1 %v2378_v18 }
 0x297   :  { %2051 = vmatprep.subr.mxu1 %v2237_v5 }
 0x298   :  { %2052 = vmatpush3.msra.mxu1 %v2385_v19 }
 0x299   :  { %2053 = vmatprep.subr.mxu1 %v2237_v5 }
 0x29a   :  { %2054 = vmatpush3.msra.mxu1 %v2392_v20  ;;  %v1063_v55 = vld [vmem:[%s2831_s12 + $0x8] sm:$0xff] }
 0x29b   :  { %2055 = vmatprep.subr.mxu1 %v2237_v5 }
 0x29c   :  { %2056 = vmatpush3.msra.mxu1 %v2399_v21 }
 0x29d   :  { %2057 = vmatprep.subr.mxu1 %v2237_v5 }
 0x29e   :  { %2058 = vmatpush3.msra.mxu1 %v2406_v22 }
 0x29f   :  { %2059 = vmatprep.subr.mxu1 %v2237_v5 }
 0x2a0   :  { %2060 = vmatpush3.msra.mxu1 %v2413_v23 }
 0x2a1   :  { %2061 = vmatprep.subr.mxu1 %v2237_v5 }
 0x2a2   :  { %2062 = vmatpush3.msra.mxu1 %v2420_v24 }
 0x2a3   :  { %2085 = vmatprep.subr.mxu1 %v2237_v5 }
 0x353   :  { %v659_v28 = vpop.f32.mrf.mxu1 }
 0x354   :  { %v663_v29 = vadd.f32 %v659_v28, %v589_v27 }
 0x355   :  { %v2027_v30 = vpop.f32.mrf.mxu1 }
 0x356   :  { %2225 = vtanh.f32 %v663_v29 }
 0x363   :  { %v2226_v31 = vpop.eup %2225 }
 0x364   :  { %1768 = vst.msk [vmem:[%s2831_s12 + $0x10] sm:$0xff] %vm179_vm3, %v2226_v31  ;;  %2045 = vmatmul.mubr.msk.f32.vlgmr.msra.gmra.mxu0 %vm179_vm3, %v2226_v31 }
 0x365   :  { %2067 = vmatpush3.msra.mxu0 %v2372_v17  ;;  %2082 = vmatprep.mubr.msk.f32.mxu0 %vm2238_vm1, %v2237_v5 }
 0x366   :  { %2068 = vmatprep.subr.mxu0 %v2237_v5 }
 0x367   :  { %2069 = vmatpush3.msra.mxu0 %v2378_v18 }
 0x368   :  { %2070 = vmatprep.subr.mxu0 %v2237_v5 }
 0x369   :  { %2071 = vmatpush3.msra.mxu0 %v2385_v19 }
 0x36a   :  { %2072 = vmatprep.subr.mxu0 %v2237_v5 }
 0x36b   :  { %2073 = vmatpush3.msra.mxu0 %v2392_v20  ;;  %v1064_v56 = vld [vmem:[%s2831_s12 + $0x10] sm:$0xff] }
 0x36c   :  { %2074 = vmatprep.subr.mxu0 %v2237_v5 }
 0x36d   :  { %2075 = vmatpush3.msra.mxu0 %v2399_v21 }
 0x36e   :  { %2076 = vmatprep.subr.mxu0 %v2237_v5 }
 0x36f   :  { %2077 = vmatpush3.msra.mxu0 %v2406_v22 }
 0x370   :  { %2078 = vmatprep.subr.mxu0 %v2237_v5 }
 0x371   :  { %2079 = vmatpush3.msra.mxu0 %v2413_v23 }
 0x372   :  { %2080 = vmatprep.subr.mxu0 %v2237_v5 }
 0x373   :  { %2081 = vmatpush3.msra.mxu0 %v2420_v24 }
 0x374   :  { %2104 = vmatprep.subr.mxu0 %v2237_v5 }
 0x424   :  { %v738_v33 = vpop.f32.mrf.mxu0 }
 0x425   :  { %v742_v34 = vadd.f32 %v738_v33, %v668_v32 }
 0x426   :  { %v2046_v35 = vpop.f32.mrf.mxu0 }
 0x427   :  { %2227 = vtanh.f32 %v742_v34 }
 0x434   :  { %v2228_v36 = vpop.eup %2227 }
 0x435   :  { %1770 = vst.msk [vmem:[%s2831_s12 + $0x18] sm:$0xff] %vm179_vm3, %v2228_v36  ;;  %2064 = vmatmul.mubr.msk.f32.vlgmr.msra.gmra.mxu1 %vm179_vm3, %v2228_v36 }
 0x436   :  { %2086 = vmatpush3.msra.mxu1 %v2372_v17  ;;  %2101 = vmatprep.mubr.msk.f32.mxu1 %vm2238_vm1, %v2237_v5 }
 0x437   :  { %2087 = vmatprep.subr.mxu1 %v2237_v5 }
 0x438   :  { %2088 = vmatpush3.msra.mxu1 %v2378_v18 }
 0x439   :  { %2089 = vmatprep.subr.mxu1 %v2237_v5 }
 0x43a   :  { %2090 = vmatpush3.msra.mxu1 %v2385_v19 }
 0x43b   :  { %2091 = vmatprep.subr.mxu1 %v2237_v5 }
 0x43c   :  { %2092 = vmatpush3.msra.mxu1 %v2392_v20  ;;  %v1065_v57 = vld [vmem:[%s2831_s12 + $0x18] sm:$0xff] }
 0x43d   :  { %2093 = vmatprep.subr.mxu1 %v2237_v5 }
 0x43e   :  { %2094 = vmatpush3.msra.mxu1 %v2399_v21 }
 0x43f   :  { %2095 = vmatprep.subr.mxu1 %v2237_v5 }
 0x440   :  { %2096 = vmatpush3.msra.mxu1 %v2406_v22 }
 0x441   :  { %2097 = vmatprep.subr.mxu1 %v2237_v5 }
 0x442   :  { %2098 = vmatpush3.msra.mxu1 %v2413_v23 }
 0x443   :  { %2099 = vmatprep.subr.mxu1 %v2237_v5 }
 0x444   :  { %2100 = vmatpush3.msra.mxu1 %v2420_v24 }
 0x445   :  { %2123 = vmatprep.subr.mxu1 %v2237_v5 }
 0x4f5   :  { %v817_v38 = vpop.f32.mrf.mxu1 }
 0x4f6   :  { %v821_v39 = vadd.f32 %v817_v38, %v747_v37 }
 0x4f7   :  { %v2065_v40 = vpop.f32.mrf.mxu1 }
 0x4f8   :  { %2229 = vtanh.f32 %v821_v39 }
 0x505   :  { %v2230_v41 = vpop.eup %2229 }
 0x506   :  { %1772 = vst.msk [vmem:[%s2831_s12 + $0x20] sm:$0xff] %vm179_vm3, %v2230_v41  ;;  %2083 = vmatmul.mubr.msk.f32.vlgmr.msra.gmra.mxu0 %vm179_vm3, %v2230_v41 }
 0x507   :  { %2105 = vmatpush3.msra.mxu0 %v2372_v17  ;;  %2120 = vmatprep.mubr.msk.f32.mxu0 %vm2238_vm1, %v2237_v5  ;;  %v826_v17 = vld [vmem:[#allocation2 + $0x28] sm:$0xff] }
 0x508   :  { %2106 = vmatprep.subr.mxu0 %v2237_v5 }
 0x509   :  { %2107 = vmatpush3.msra.mxu0 %v2378_v18 }
 0x50a   :  { %2108 = vmatprep.subr.mxu0 %v2237_v5 }
 0x50b   :  { %2109 = vmatpush3.msra.mxu0 %v2385_v19 }
 0x50c   :  { %2110 = vmatprep.subr.mxu0 %v2237_v5 }
 0x50d   :  { %2111 = vmatpush3.msra.mxu0 %v2392_v20  ;;  %v1066_v58 = vld [vmem:[%s2831_s12 + $0x20] sm:$0xff] }
 0x50e   :  { %2112 = vmatprep.subr.mxu0 %v2237_v5 }
 0x50f   :  { %2113 = vmatpush3.msra.mxu0 %v2399_v21  ;;  %v1076_v21 = vld [vmem:[%s2832_s9 + $0x38] sm:$0xff] }
 0x510   :  { %2114 = vmatprep.subr.mxu0 %v2237_v5 }
 0x511   :  { %2115 = vmatpush3.msra.mxu0 %v2406_v22 }
 0x512   :  { %2116 = vmatprep.subr.mxu0 %v2237_v5 }
 0x513   :  { %2117 = vmatpush3.msra.mxu0 %v2413_v23  ;;  %v1075_v23 = vld [vmem:[%s2832_s9 + $0x30] sm:$0xff] }
 0x514   :  { %2118 = vmatprep.subr.mxu0 %v2237_v5 }
 0x515   :  { %2119 = vmatpush3.msra.mxu0 %v2420_v24  ;;  %v1074_v24 = vld [vmem:[%s2832_s9 + $0x28] sm:$0xff] }
 0x516   :  { %2160 = vmatprep.subr.mxu0 %v2237_v5 }
 0x5c6   :  { %v896_v18 = vpop.f32.mrf.mxu0 }
 0x5c7   :  { %v900_v19 = vadd.f32 %v896_v18, %v826_v17 }
 0x5c8   :  { %v2084_v20 = vpop.f32.mrf.mxu0 }
 0x5c9   :  { %2231 = vtanh.f32 %v900_v19 }
 0x5d6   :  { %v2232_v22 = vpop.eup %2231 }
 0x5d7   :  { %1774 = vst.msk [vmem:[%s2831_s12 + $0x28] sm:$0xff] %vm179_vm3, %v2232_v22  ;;  %2102 = vmatmul.mubr.msk.f32.vlgmr.msra.gmra.mxu1 %vm179_vm3, %v2232_v22 }
 0x5d8   :  { %2124 = vmatpush3.msra.mxu1 %v1076_v21  ;;  %2139 = vmatprep.mubr.msk.f32.mxu1 %vm2238_vm1, %v2237_v5 }
 0x5d9   :  { %2125 = vmatprep.subr.mxu1 %v2237_v5 }
 0x5da   :  { %2126 = vmatpush3.msra.mxu1 %v1075_v23 }
 0x5db   :  { %2127 = vmatprep.subr.mxu1 %v2237_v5 }
 0x5dc   :  { %2128 = vmatpush3.msra.mxu1 %v1074_v24 }
 0x5dd   :  { %2129 = vmatprep.subr.mxu1 %v2237_v5 }
 0x5de   :  { %2130 = vmatpush3.msra.mxu1 %v1073_v43  ;;  %v1067_v59 = vld [vmem:[%s2831_s12 + $0x28] sm:$0xff] }
 0x5df   :  { %2131 = vmatprep.subr.mxu1 %v2237_v5 }
 0x5e0   :  { %2132 = vmatpush3.msra.mxu1 %v1072_v44 }
 0x5e1   :  { %2133 = vmatprep.subr.mxu1 %v2237_v5 }
 0x5e2   :  { %2134 = vmatpush3.msra.mxu1 %v1071_v45 }
 0x5e3   :  { %2135 = vmatprep.subr.mxu1 %v2237_v5 }
 0x5e4   :  { %2136 = vmatpush3.msra.mxu1 %v1070_v46 }
 0x5e5   :  { %2137 = vmatprep.subr.mxu1 %v2237_v5 }
 0x5e6   :  { %2138 = vmatpush3.msra.mxu1 %v1069_v47 }
 0x5e7   :  { %2140 = vmatmul.mubr.msk.f32.vlgmr.msra.gmra.mxu1 %vm179_vm3, %v1062_v54 }
 0x5e8   :  { %2142 = vmatprep.mubr.msk.f32.mxu1 %vm2238_vm1, %v2237_v5 }
 0x5eb   :  { %2143 = vmatmul.mubr.msk.f32.gmra.mxu1 %vm179_vm3, %v1063_v55 }
 0x5ec   :  { %2145 = vmatprep.mubr.msk.f32.mxu1 %vm2238_vm1, %v2237_v5 }
 0x5ef   :  { %2146 = vmatmul.mubr.msk.f32.gmra.mxu1 %vm179_vm3, %v1064_v56 }
 0x5f0   :  { %2148 = vmatprep.mubr.msk.f32.mxu1 %vm2238_vm1, %v2237_v5 }
 0x5f3   :  { %2149 = vmatmul.mubr.msk.f32.gmra.mxu1 %vm179_vm3, %v1065_v57 }
 0x5f4   :  { %2151 = vmatprep.mubr.msk.f32.mxu1 %vm2238_vm1, %v2237_v5 }
 0x5f7   :  { %2152 = vmatmul.mubr.msk.f32.gmra.mxu1 %vm179_vm3, %v1066_v58 }
 0x5f8   :  { %2154 = vmatprep.mubr.msk.f32.mxu1 %vm2238_vm1, %v2237_v5 }
 0x5fb   :  { %2155 = vmatmul.mubr.msk.f32.gmra.mxu1 %vm179_vm3, %v1067_v59 }
 0x5fc   :  { %2157 = vmatprep.mubr.msk.f32.mxu1 %vm2238_vm1, %v2237_v5 }
 0x697   :  { %v975_v61 = vpop.f32.mrf.mxu1 }
 0x698   :  { %v979_v62 = vadd.f32 %v975_v61, %v905_v60 }
 0x699   :  { %v2103_v63 = vpop.f32.mrf.mxu1 }
 0x69a   :  { %2233 = vtanh.f32 %v979_v62 }
 0x6a7   :  { %v2234_v1 = vpop.eup %2233  ;;  %v1171_v2 = vpop.f32.mrf.mxu1 }
 0x6a8   :  { %1776 = vst.msk [vmem:[%s2831_s12 + $0x30] sm:$0xff] %vm179_vm3, %v2234_v1  ;;  %v1172_v3 = vadd.f32 %v1779_v0, %v1171_v2  ;;  %2121 = vmatmul.mubr.msk.f32.vlgmr.msra.gmra.mxu0 %vm179_vm3, %v2234_v1 }
 0x6a9   :  { %v2141_v4 = vpop.f32.mrf.mxu1  ;;  %2162 = vmatprep.mubr.msk.f32.mxu0 %vm2238_vm1, %v2237_v5 }
 0x6aa   :  { %2161 = vmatpush3.xpose.msk.msra.mxu0 %vm179_vm3, %v1172_v3 }
 0x6ab   :  { %v1176_v6 = vpop.f32.mrf.mxu1  ;;  %2165 = vmatprep.subr.mxu0 %v2237_v5 }
 0x6ac   :  { %v1177_v7 = vadd.f32 %v1779_v0, %v1176_v6 }
 0x6ad   :  { %v2144_v8 = vpop.f32.mrf.mxu1  ;;  %2163 = vmatmul.mubr.msk.f32.vlgmr.msra.gmra.mxu0 %vm179_vm3, %v2450_v49 }
 0x6ae   :  { %2166 = vmatpush3.xpose.msk.msra.mxu0 %vm179_vm3, %v1177_v7  ;;  %2167 = vmatprep.mubr.msk.f32.mxu0 %vm2238_vm1, %v2237_v5 }
 0x6af   :  { %v1181_v9 = vpop.f32.mrf.mxu1  ;;  %v1068_v10 = vld [vmem:[%s2831_s12 + $0x30] sm:$0xff]  ;;  %2170 = vmatprep.subr.mxu0 %v2237_v5 }
 0x6b0   :  { %v1182_v11 = vadd.f32 %v1779_v0, %v1181_v9  ;;  %2158 = vmatmul.mubr.msk.f32.gmra.mxu1 %vm179_vm3, %v1068_v10 }
 0x6b1   :  { %v2147_v12 = vpop.f32.mrf.mxu1  ;;  %2168 = vmatmul.mubr.msk.f32.vlgmr.msra.gmra.mxu0 %vm179_vm3, %v2428_v42 }
 0x6b2   :  { %2171 = vmatpush3.xpose.msk.msra.mxu0 %vm179_vm3, %v1182_v11  ;;  %2172 = vmatprep.mubr.msk.f32.mxu0 %vm2238_vm1, %v2237_v5 }
 0x6b3   :  { %v1186_v49 = vpop.f32.mrf.mxu1  ;;  %2175 = vmatprep.subr.mxu0 %v2237_v5 }
 0x6b4   :  { %v1187_v13 = vadd.f32 %v1779_v0, %v1186_v49 }
 0x6b5   :  { %v2150_v14 = vpop.f32.mrf.mxu1  ;;  %2173 = vmatmul.mubr.msk.f32.vlgmr.msra.gmra.mxu0 %vm179_vm3, %v2443_v48 }
 0x6b6   :  { %2176 = vmatpush3.xpose.msk.msra.mxu0 %vm179_vm3, %v1187_v13  ;;  %2177 = vmatprep.mubr.msk.f32.mxu0 %vm2238_vm1, %v2237_v5 }
 0x6b7   :  { %v1191_v15 = vpop.f32.mrf.mxu1  ;;  %2180 = vmatprep.subr.mxu0 %v2237_v5 }
 0x6b8   :  { %v1192_v42 = vadd.f32 %v1779_v0, %v1191_v15 }
 0x6b9   :  { %v2153_v16 = vpop.f32.mrf.mxu1  ;;  %2178 = vmatmul.mubr.msk.f32.vlgmr.msra.gmra.mxu0 %vm179_vm3, %v2470_v51  ;;  %v984_v51 = vld [vmem:[#allocation2 + $0x38] sm:$0xff] }
 0x6ba   :  { %2181 = vmatpush3.xpose.msk.msra.mxu0 %vm179_vm3, %v1192_v42  ;;  %2182 = vmatprep.mubr.msk.f32.mxu0 %vm2238_vm1, %v2237_v5 }
 0x6bb   :  { %v1196_v25 = vpop.f32.mrf.mxu1  ;;  %2185 = vmatprep.subr.mxu0 %v2237_v5 }
 0x6bc   :  { %v1197_v48 = vadd.f32 %v1779_v0, %v1196_v25 }
 0x6bd   :  { %v2156_v26 = vpop.f32.mrf.mxu1  ;;  %2183 = vmatmul.mubr.msk.f32.vlgmr.msra.gmra.mxu0 %vm179_vm3, %v2492_v53 }
 0x6be   :  { %2186 = vmatpush3.xpose.msk.msra.mxu0 %vm179_vm3, %v1197_v48  ;;  %2187 = vmatprep.mubr.msk.f32.mxu0 %vm2238_vm1, %v2237_v5 }
 0x6bf   :  { %2190 = vmatprep.subr.mxu0 %v2237_v5 }
 0x6c1   :  { %2188 = vmatmul.mubr.msk.f32.vlgmr.msra.gmra.mxu0 %vm179_vm3, %v2459_v50 }
 0x6c2   :  { %2192 = vmatprep.mubr.msk.f32.mxu0 %vm2238_vm1, %v2237_v5 }
 0x768   :  { %v1054_v27 = vpop.f32.mrf.mxu0 }
 0x769   :  { %v1058_v28 = vadd.f32 %v1054_v27, %v984_v51 }
 0x76a   :  { %v2122_v29 = vpop.f32.mrf.mxu0 }
 0x76b   :  { %2235 = vtanh.f32 %v1058_v28 }
 0x76d   :  { %v1274_v30 = vpop.f32.mrf.mxu0 }
 0x76e   :  { %v1716_v53 = vmul.f32 14.285714, %v1274_v30 }
 0x76f   :  { %v2164_v31 = vpop.f32.mrf.mxu0 }
 0x770   :  { %1723 = vst.msk [vmem:[%s2834_s13] sm:$0xff] %vm349_vm2, %v1716_v53  ;;  %v1201_v32 = vpop.f32.mrf.mxu1 }
 0x771   :  { %v1202_v33 = vadd.f32 %v1779_v0, %v1201_v32  ;;  %v1347_v34 = vpop.f32.mrf.mxu0 }
 0x772   :  { %v1717_v50 = vmul.f32 14.285714, %v1347_v34  ;;  %v2159_v35 = vpop.f32.mrf.mxu1 }
 0x773   :  { %v2169_v36 = vpop.f32.mrf.mxu0  ;;  %2191 = vmatpush3.xpose.msk.msra.mxu0 %vm179_vm3, %v1202_v33 }
 0x774   :  { %1724 = vst.msk [vmem:[%s2834_s13 + $0x8] sm:$0xff] %vm349_vm2, %v1717_v50 }
 0x775   :  { %v1420_v5 = vpop.f32.mrf.mxu0 }
 0x776   :  { %v1718_v37 = vmul.f32 14.285714, %v1420_v5  ;;  %2193 = vmatmul.mubr.msk.f32.vlgmr.msra.gmra.mxu0 %vm179_vm3, %v2481_v52 }
 0x777   :  { %v2174_v38 = vpop.f32.mrf.mxu0 }
 0x778   :  { %v2236_v39 = vpop.eup %2235  ;;  %1725 = vst.msk [vmem:[%s2834_s13 + $0x10] sm:$0xff] %vm349_vm2, %v1718_v37 }
 0x779   :  { %1778 = vst.msk [vmem:[%s2831_s12 + $0x38] sm:$0xff] %vm179_vm3, %v2236_v39  ;;  %v1493_v40 = vpop.f32.mrf.mxu0 }
 0x77a   :  { %v1719_v41 = vmul.f32 14.285714, %v1493_v40 }
 0x77b   :  { %v2179_v17 = vpop.f32.mrf.mxu0 }
 0x77c   :  { %1726 = vst.msk [vmem:[%s2834_s13 + $0x18] sm:$0xff] %vm349_vm2, %v1719_v41 }
 0x77d   :  { %v1566_v52 = vpop.f32.mrf.mxu0 }
 0x77e   :  { %v1720_v18 = vmul.f32 14.285714, %v1566_v52 }
 0x77f   :  { %v2184_v19 = vpop.f32.mrf.mxu0 }
 0x780   :  { %1727 = vst.msk [vmem:[%s2834_s13 + $0x20] sm:$0xff] %vm349_vm2, %v1720_v18 }
 0x781   :  { %v1639_v20 = vpop.f32.mrf.mxu0 }
 0x782   :  { %v1721_v21 = vmul.f32 14.285714, %v1639_v20 }
 0x783   :  { %v2189_v22 = vpop.f32.mrf.mxu0 }
 0x784   :  { %1728 = vst.msk [vmem:[%s2834_s13 + $0x28] sm:$0xff] %vm349_vm2, %v1721_v21 }
 0x836   :  { %v1712_v23 = vpop.f32.mrf.mxu0 }
 0x837   :  { %v1722_v24 = vmul.f32 14.285714, %v1712_v23 }
 0x838   :  { %v2194_v43 = vpop.f32.mrf.mxu0 }
 0x839   :  { %1729 = vst.msk [vmem:[%s2834_s13 + $0x30] sm:$0xff] %vm349_vm2, %v1722_v24 }

</bundles_post_ra>
